<compile_context>
chip_gen: v6e
topology: v6e:2x2x1
jax: 0.10.0
libtpu: 0.0.40
codegen_flags: <defaults>
</compile_context>

<pallas_src>
import functools

import jax
import jax.numpy as jnp
from jax import lax
from jax.experimental import pallas as pl
from jax.experimental.pallas import tpu as pltpu


def _fe_kernel(feat_ref, w1t_ref, b1_ref, w2t_ref, b2_ref, wred_ref,
               P_ref, gamma_ref, beta_ref, out_ref, *, cpg, hw_true, eps):
    # feat_ref block: (Bt, C_in, HWp)  (bf16 or f32, zero-padded along HW)
    # out_ref  block: (Bt, C_out, HWp) (f32)
    bt = feat_ref.shape[0]
    x = feat_ref[...]
    inv_hw = jnp.float32(1.0 / hw_true)
    inv_n = jnp.float32(1.0 / (cpg * hw_true))

    # ---- SE branch (layer_weights), vectorized over the Bt batch tile ----
    # zero-padded HW columns contribute 0 to the sums; divide by the true HW.
    pooled = jnp.sum(x.astype(jnp.float32), axis=2) * inv_hw              # (Bt, C_in)
    hid = jnp.dot(pooled, w1t_ref[...],
                  preferred_element_type=jnp.float32) + b1_ref[...]       # (Bt, C_hid)
    hid = jnp.maximum(hid, 0.0)                                           # ReLU
    logits = jnp.dot(hid, w2t_ref[...],
                     preferred_element_type=jnp.float32) + b2_ref[...]    # (Bt, C_in)
    attn = jax.nn.sigmoid(logits)                                         # (Bt, C_in)

    wred = wred_ref[...]        # (C_out, C_in) f32
    P = P_ref[...]              # (C_out, C_out) group-membership matrix
    gamma = gamma_ref[...]      # (C_out, 1)
    beta = beta_ref[...]        # (C_out, 1)

    for i in range(bt):         # small static trip count -> unrolled
        # Fold attention into the small weight, cast to the feat dtype so the
        # big matmul is a native bf16 MXU op fed straight from the pipelined
        # feat block (no VPU pass over the whole activation tile).
        w_dyn = (wred * attn[i:i + 1, :]).astype(x.dtype)                 # (C_out, C_in)
        y = jnp.dot(w_dyn, x[i], preferred_element_type=jnp.float32)      # (C_out, HWp)

        # ---- GroupNorm: single fused P @ [row_sum, row_sumsq] reduction ----
        # (one-pass E[y^2]-E[y]^2; adequate at these activation magnitudes)
        stats = jnp.concatenate(
            [jnp.sum(y, axis=1, keepdims=True),
             jnp.sum(y * y, axis=1, keepdims=True)], axis=1)              # (C_out, 2)
        gstats = jnp.dot(P, stats, preferred_element_type=jnp.float32)    # (C_out, 2)
        mean = gstats[:, 0:1] * inv_n
        var = gstats[:, 1:2] * inv_n - mean * mean
        inv_std = lax.rsqrt(var + eps)
        yn = (y - mean) * (inv_std * gamma) + beta

        # ---- activation (ReLU) ----
        out_ref[i] = jnp.maximum(yn, 0.0).astype(out_ref.dtype)


def feature_enhancement(feat_bchw, params, *, num_groups=4, eps=1e-5,
                        block_b=None, feat_dtype=jnp.bfloat16):
    """feat_bchw: (B, C_in, H, W) float32 -> (B, C_out, H, W) float32."""
    b, c_in, h, w = feat_bchw.shape
    hw = h * w
    hw_pad = ((hw + 127) // 128) * 128          # lane-dense output slab
    w1, b1, w2, b2, w_red, gamma, beta = params
    c_out = w_red.shape[0]
    cpg = c_out // num_groups

    feat = feat_bchw.reshape(b, c_in, hw).astype(feat_dtype)
    if hw_pad != hw:
        feat = jnp.pad(feat, ((0, 0), (0, 0), (0, hw_pad - hw)))

    in_item = c_in * hw_pad * jnp.dtype(feat_dtype).itemsize
    out_item = c_out * hw_pad * 4
    per_item = in_item + out_item

    if block_b is None:
        # Largest divisor of B whose double-buffered blocks stay well under
        # VMEM on every generation (v7x has only 64 MiB physical VMEM).
        budget = 10 * 1024 * 1024               # per-buffer budget (x2 for double buffering)
        block_b = int(max(1, min(b, budget // max(per_item, 1))))
        while b % block_b != 0:
            block_b -= 1
    grid = (b // block_b,)

    # Constant operands (constant index_map -> DMA'd once, kept resident).
    w1t = w1.T                                  # (C_in, C_hid)
    w2t = w2.T                                  # (C_hid, C_in)
    b1r = b1.reshape(1, -1)
    b2r = b2.reshape(1, -1)
    gammac = gamma.reshape(-1, 1)
    betac = beta.reshape(-1, 1)
    gid = jnp.arange(c_out) // cpg
    P = (gid[:, None] == gid[None, :]).astype(jnp.float32)    # (C_out, C_out)

    const_bytes = sum(int(a.size) * a.dtype.itemsize
                      for a in (w1t, b1r, w2t, b2r, w_red, P, gammac, betac))
    vmem_limit = 2 * block_b * per_item + const_bytes + (8 << 20)
    vmem_limit = int(min(max(vmem_limit, 32 << 20), 64 << 20))

    kernel = functools.partial(_fe_kernel, cpg=cpg, hw_true=hw, eps=eps)
    const_spec = lambda shape: pl.BlockSpec(shape, lambda i: (0,) * len(shape))

    out = pl.pallas_call(
        kernel,
        out_shape=jax.ShapeDtypeStruct((b, c_out, hw_pad), jnp.float32),
        grid_spec=pltpu.PrefetchScalarGridSpec(
            num_scalar_prefetch=0,
            grid=grid,
            in_specs=[
                pl.BlockSpec((block_b, c_in, hw_pad), lambda i: (i, 0, 0)),  # feat
                const_spec(w1t.shape),                                       # W1^T
                const_spec(b1r.shape),                                       # b1
                const_spec(w2t.shape),                                       # W2^T
                const_spec(b2r.shape),                                       # b2
                const_spec(w_red.shape),                                     # W_red
                const_spec(P.shape),                                         # group mask
                const_spec(gammac.shape),                                    # GN gamma
                const_spec(betac.shape),                                     # GN beta
            ],
            out_specs=pl.BlockSpec((block_b, c_out, hw_pad), lambda i: (i, 0, 0)),
        ),
        compiler_params=pltpu.CompilerParams(
            dimension_semantics=("parallel",),
            vmem_limit_bytes=vmem_limit),
    )(feat, w1t, b1r, w2t, b2r, w_red, P, gammac, betac)

    if hw_pad != hw:
        out = out[:, :, :hw]
    return out.reshape(b, c_out, h, w)


def feature_enhancement_ref(feat, params, *, num_groups=4, eps=1e-5):
    """Pure-JAX f32 reference mirroring the PyTorch forward."""
    b, c_in, h, w = feat.shape
    w1, b1, w2, b2, w_red, gamma, beta = params
    c_out = w_red.shape[0]
    hw = h * w

    pooled = feat.mean(axis=(2, 3))                                 # (b, C_in)
    hid = jax.nn.relu(pooled @ w1.T + b1)                           # (b, C_hid)
    attn = jax.nn.sigmoid(hid @ w2.T + b2)                          # (b, C_in)

    conv_w = attn[:, None, :] * w_red[None, :, :]                   # (b, C_out, C_in)
    featv = feat.reshape(b, c_in, hw)
    y = jnp.einsum('boc,bcs->bos', conv_w, featv)                   # (b, C_out, hw)

    cpg = c_out // num_groups
    yg = y.reshape(b, num_groups, cpg * hw)
    mean = yg.mean(axis=2, keepdims=True)
    var = ((yg - mean) ** 2).mean(axis=2, keepdims=True)
    yn = ((yg - mean) / jnp.sqrt(var + eps)).reshape(b, c_out, hw)
    yn = yn * gamma[None, :, None] + beta[None, :, None]
    return jax.nn.relu(yn).reshape(b, c_out, h, w)


def make_params(key, c_in, c_out, ratio):
    c_hid = c_in // ratio
    k1, k2, k3, k4, k5 = jax.random.split(key, 5)
    w1 = 0.001 * jax.random.normal(k1, (c_hid, c_in), jnp.float32)    # 1x1 conv
    b1 = 0.01 * jax.random.normal(k2, (c_hid,), jnp.float32)
    w2 = 0.001 * jax.random.normal(k3, (c_in, c_hid), jnp.float32)    # 1x1 conv
    b2 = 0.01 * jax.random.normal(k4, (c_in,), jnp.float32)
    w_red = 0.01 * jax.random.normal(k5, (c_out, c_in), jnp.float32)  # reduction conv (1x1)
    gamma = jnp.ones((c_out,), jnp.float32)                           # GN weight
    beta = jnp.zeros((c_out,), jnp.float32)                           # GN bias
    return (w1, b1, w2, b2, w_red, gamma, beta)


if __name__ == "__main__":
    B, C_IN, C_OUT, H, W = 2, 64, 32, 16, 16
    RATIO, GROUPS = 16, 4

    key = jax.random.PRNGKey(0)
    kf, kp = jax.random.split(key)
    feat = jax.random.normal(kf, (B, C_IN, H, W), jnp.float32)
    params = make_params(kp, C_IN, C_OUT, RATIO)

    out = feature_enhancement(feat, params, num_groups=GROUPS)
    out = jax.block_until_ready(out)
    assert out.shape == (B, C_OUT, H, W)

    # Reference computed on the same bf16-quantized feat the kernel streams;
    # remaining differences are the bf16 dynamic-weight quantization on the MXU.
    feat_q = feat.astype(jnp.bfloat16).astype(jnp.float32)
    ref = feature_enhancement_ref(feat_q, params, num_groups=GROUPS)
    err = float(jnp.abs(out - ref).max())
    assert jnp.allclose(out, ref, atol=3e-2, rtol=3e-2), err

    print("KERNEL_OK")
</pallas_src>

<mosaic_0001>
module attributes {stable_mosaic.version = 11 : i64} {
  func.func @_fe_kernel(%arg0: i32, %arg1: memref<2x64x256xbf16, #tpu.memory_space<vmem>>, %arg2: memref<64x4xf32, #tpu.memory_space<vmem>>, %arg3: memref<1x4xf32, #tpu.memory_space<vmem>>, %arg4: memref<4x64xf32, #tpu.memory_space<vmem>>, %arg5: memref<1x64xf32, #tpu.memory_space<vmem>>, %arg6: memref<32x64xf32, #tpu.memory_space<vmem>>, %arg7: memref<32x32xf32, #tpu.memory_space<vmem>>, %arg8: memref<32x1xf32, #tpu.memory_space<vmem>>, %arg9: memref<32x1xf32, #tpu.memory_space<vmem>>, %arg10: memref<2x32x256xf32, #tpu.memory_space<vmem>>) attributes {dimension_semantics = [#tpu.dimension_semantics<parallel>], iteration_bounds = array<i64: 1>, scalar_prefetch = 0 : i64, scratch_operands = 0 : i64, tpu.core_type = #tpu.core_type<tc>, window_params = [{transform_indices = @transform_0, window_bounds = array<i64: 2, 64, 256>}, {pipeline_mode = #tpu.pipeline_mode<synchronous>, transform_indices = @transform_1, window_bounds = array<i64: 64, 4>}, {pipeline_mode = #tpu.pipeline_mode<synchronous>, transform_indices = @transform_2, window_bounds = array<i64: 1, 4>}, {pipeline_mode = #tpu.pipeline_mode<synchronous>, transform_indices = @transform_3, window_bounds = array<i64: 4, 64>}, {pipeline_mode = #tpu.pipeline_mode<synchronous>, transform_indices = @transform_4, window_bounds = array<i64: 1, 64>}, {pipeline_mode = #tpu.pipeline_mode<synchronous>, transform_indices = @transform_5, window_bounds = array<i64: 32, 64>}, {pipeline_mode = #tpu.pipeline_mode<synchronous>, transform_indices = @transform_6, window_bounds = array<i64: 32, 32>}, {pipeline_mode = #tpu.pipeline_mode<synchronous>, transform_indices = @transform_7, window_bounds = array<i64: 32, 1>}, {pipeline_mode = #tpu.pipeline_mode<synchronous>, transform_indices = @transform_8, window_bounds = array<i64: 32, 1>}, {transform_indices = @transform_9, window_bounds = array<i64: 2, 32, 256>}]} {
    %c0 = arith.constant 0 : index
    %c0_0 = arith.constant 0 : index
    %c0_1 = arith.constant 0 : index
    %0 = vector.load %arg1[%c0, %c0_0, %c0_1] : memref<2x64x256xbf16, #tpu.memory_space<vmem>>, vector<2x64x256xbf16>
    %1 = arith.extf %0 : vector<2x64x256xbf16> to vector<2x64x256xf32>
    %cst = arith.constant dense<0.000000e+00> : vector<2x64xf32>
    %2 = vector.multi_reduction <add>, %1, %cst [2] : vector<2x64x256xf32> to vector<2x64xf32>
    %cst_2 = arith.constant 3.906250e-03 : f32
    %3 = vector.broadcast %cst_2 : f32 to vector<2x64xf32>
    %4 = arith.mulf %2, %3 : vector<2x64xf32>
    %c0_3 = arith.constant 0 : index
    %c0_4 = arith.constant 0 : index
    %5 = vector.load %arg2[%c0_3, %c0_4] : memref<64x4xf32, #tpu.memory_space<vmem>>, vector<64x4xf32>
    %cst_5 = arith.constant dense<0.000000e+00> : vector<2x4xf32>
    %6 = tpu.matmul %4, %5, %cst_5 {dimension_numbers = #tpu.dot_dimension_numbers<[1], [0], [0], [1], [0, 0, 1, 1], [], []>} : vector<2x64xf32>, vector<64x4xf32>, vector<2x4xf32> -> vector<2x4xf32>
    %c0_6 = arith.constant 0 : index
    %c0_7 = arith.constant 0 : index
    %7 = vector.load %arg3[%c0_6, %c0_7] : memref<1x4xf32, #tpu.memory_space<vmem>>, vector<1x4xf32>
    %8 = vector.broadcast %7 : vector<1x4xf32> to vector<2x4xf32>
    %9 = arith.addf %6, %8 : vector<2x4xf32>
    %cst_8 = arith.constant 0.000000e+00 : f32
    %10 = vector.broadcast %cst_8 : f32 to vector<2x4xf32>
    %11 = arith.maximumf %9, %10 : vector<2x4xf32>
    %c0_9 = arith.constant 0 : index
    %c0_10 = arith.constant 0 : index
    %12 = vector.load %arg4[%c0_9, %c0_10] : memref<4x64xf32, #tpu.memory_space<vmem>>, vector<4x64xf32>
    %cst_11 = arith.constant dense<0.000000e+00> : vector<2x64xf32>
    %13 = tpu.matmul %11, %12, %cst_11 {dimension_numbers = #tpu.dot_dimension_numbers<[1], [0], [0], [1], [0, 0, 1, 1], [], []>} : vector<2x4xf32>, vector<4x64xf32>, vector<2x64xf32> -> vector<2x64xf32>
    %c0_12 = arith.constant 0 : index
    %c0_13 = arith.constant 0 : index
    %14 = vector.load %arg5[%c0_12, %c0_13] : memref<1x64xf32, #tpu.memory_space<vmem>>, vector<1x64xf32>
    %15 = vector.broadcast %14 : vector<1x64xf32> to vector<2x64xf32>
    %16 = arith.addf %13, %15 : vector<2x64xf32>
    %17 = arith.negf %16 : vector<2x64xf32>
    %18 = math.exp %17 : vector<2x64xf32>
    %cst_14 = arith.constant 1.000000e+00 : f32
    %19 = vector.broadcast %cst_14 : f32 to vector<2x64xf32>
    %20 = arith.addf %19, %18 : vector<2x64xf32>
    %21 = arith.divf %19, %20 : vector<2x64xf32>
    %c0_15 = arith.constant 0 : index
    %c0_16 = arith.constant 0 : index
    %22 = vector.load %arg6[%c0_15, %c0_16] : memref<32x64xf32, #tpu.memory_space<vmem>>, vector<32x64xf32>
    %c0_17 = arith.constant 0 : index
    %c0_18 = arith.constant 0 : index
    %23 = vector.load %arg7[%c0_17, %c0_18] : memref<32x32xf32, #tpu.memory_space<vmem>>, vector<32x32xf32>
    %c0_19 = arith.constant 0 : index
    %c0_20 = arith.constant 0 : index
    %24 = vector.load %arg8[%c0_19, %c0_20] : memref<32x1xf32, #tpu.memory_space<vmem>>, vector<32x1xf32>
    %c0_21 = arith.constant 0 : index
    %c0_22 = arith.constant 0 : index
    %25 = vector.load %arg9[%c0_21, %c0_22] : memref<32x1xf32, #tpu.memory_space<vmem>>, vector<32x1xf32>
    %26 = vector.extract_strided_slice %21 {offsets = [0, 0], sizes = [1, 64], strides = [1, 1]} : vector<2x64xf32> to vector<1x64xf32>
    %27 = vector.broadcast %26 : vector<1x64xf32> to vector<32x64xf32>
    %28 = arith.mulf %22, %27 : vector<32x64xf32>
    %29 = arith.truncf %28 : vector<32x64xf32> to vector<32x64xbf16>
    %30 = vector.extract_strided_slice %0 {offsets = [0, 0, 0], sizes = [1, 64, 256], strides = [1, 1, 1]} : vector<2x64x256xbf16> to vector<1x64x256xbf16>
    %31 = vector.shape_cast %30 : vector<1x64x256xbf16> to vector<64x256xbf16>
    %cst_23 = arith.constant dense<0.000000e+00> : vector<32x256xf32>
    %32 = tpu.matmul %29, %31, %cst_23 {dimension_numbers = #tpu.dot_dimension_numbers<[1], [0], [0], [1], [0, 0, 1, 1], [], []>} : vector<32x64xbf16>, vector<64x256xbf16>, vector<32x256xf32> -> vector<32x256xf32>
    %cst_24 = arith.constant dense<0.000000e+00> : vector<32xf32>
    %33 = vector.multi_reduction <add>, %32, %cst_24 [1] : vector<32x256xf32> to vector<32xf32>
    %34 = vector.shape_cast %33 : vector<32xf32> to vector<32x1xf32>
    %35 = arith.mulf %32, %32 : vector<32x256xf32>
    %cst_25 = arith.constant dense<0.000000e+00> : vector<32xf32>
    %36 = vector.multi_reduction <add>, %35, %cst_25 [1] : vector<32x256xf32> to vector<32xf32>
    %37 = vector.shape_cast %36 : vector<32xf32> to vector<32x1xf32>
    %38 = tpu.concatenate %34, %37 in 1 : vector<32x1xf32>, vector<32x1xf32> -> vector<32x2xf32>
    %cst_26 = arith.constant dense<0.000000e+00> : vector<32x2xf32>
    %39 = tpu.matmul %23, %38, %cst_26 {dimension_numbers = #tpu.dot_dimension_numbers<[1], [0], [0], [1], [0, 0, 1, 1], [], []>} : vector<32x32xf32>, vector<32x2xf32>, vector<32x2xf32> -> vector<32x2xf32>
    %40 = vector.extract_strided_slice %39 {offsets = [0, 0], sizes = [32, 1], strides = [1, 1]} : vector<32x2xf32> to vector<32x1xf32>
    %cst_27 = arith.constant 4.8828125E-4 : f32
    %41 = vector.broadcast %cst_27 : f32 to vector<32x1xf32>
    %42 = arith.mulf %40, %41 : vector<32x1xf32>
    %43 = vector.extract_strided_slice %39 {offsets = [0, 1], sizes = [32, 1], strides = [1, 1]} : vector<32x2xf32> to vector<32x1xf32>
    %cst_28 = arith.constant 4.8828125E-4 : f32
    %44 = vector.broadcast %cst_28 : f32 to vector<32x1xf32>
    %45 = arith.mulf %43, %44 : vector<32x1xf32>
    %46 = arith.mulf %42, %42 : vector<32x1xf32>
    %47 = arith.subf %45, %46 : vector<32x1xf32>
    %cst_29 = arith.constant 9.99999974E-6 : f32
    %48 = vector.broadcast %cst_29 : f32 to vector<32x1xf32>
    %49 = arith.addf %47, %48 : vector<32x1xf32>
    %50 = math.rsqrt %49 : vector<32x1xf32>
    %51 = vector.broadcast %42 : vector<32x1xf32> to vector<32x256xf32>
    %52 = arith.subf %32, %51 : vector<32x256xf32>
    %53 = arith.mulf %50, %24 : vector<32x1xf32>
    %54 = vector.broadcast %53 : vector<32x1xf32> to vector<32x256xf32>
    %55 = arith.mulf %52, %54 : vector<32x256xf32>
    %56 = vector.broadcast %25 : vector<32x1xf32> to vector<32x256xf32>
    %57 = arith.addf %55, %56 : vector<32x256xf32>
    %cst_30 = arith.constant 0.000000e+00 : f32
    %58 = vector.broadcast %cst_30 : f32 to vector<32x256xf32>
    %59 = arith.maximumf %57, %58 : vector<32x256xf32>
    %c0_31 = arith.constant 0 : index
    %c0_32 = arith.constant 0 : index
    %c0_33 = arith.constant 0 : index
    %60 = vector.load %arg10[%c0_31, %c0_32, %c0_33] : memref<2x32x256xf32, #tpu.memory_space<vmem>>, vector<1x32x256xf32>
    %61 = vector.shape_cast %60 : vector<1x32x256xf32> to vector<32x256xf32>
    %62 = vector.shape_cast %59 : vector<32x256xf32> to vector<1x32x256xf32>
    tpu.vector_store %arg10[%c0_31, %c0_32, %c0_33], %62 {strides = array<i32>} : memref<2x32x256xf32, #tpu.memory_space<vmem>>, vector<1x32x256xf32>,
    %63 = vector.extract_strided_slice %21 {offsets = [1, 0], sizes = [1, 64], strides = [1, 1]} : vector<2x64xf32> to vector<1x64xf32>
    %64 = vector.broadcast %63 : vector<1x64xf32> to vector<32x64xf32>
    %65 = arith.mulf %22, %64 : vector<32x64xf32>
    %66 = arith.truncf %65 : vector<32x64xf32> to vector<32x64xbf16>
    %67 = vector.extract_strided_slice %0 {offsets = [1, 0, 0], sizes = [1, 64, 256], strides = [1, 1, 1]} : vector<2x64x256xbf16> to vector<1x64x256xbf16>
    %68 = vector.shape_cast %67 : vector<1x64x256xbf16> to vector<64x256xbf16>
    %cst_34 = arith.constant dense<0.000000e+00> : vector<32x256xf32>
    %69 = tpu.matmul %66, %68, %cst_34 {dimension_numbers = #tpu.dot_dimension_numbers<[1], [0], [0], [1], [0, 0, 1, 1], [], []>} : vector<32x64xbf16>, vector<64x256xbf16>, vector<32x256xf32> -> vector<32x256xf32>
    %cst_35 = arith.constant dense<0.000000e+00> : vector<32xf32>
    %70 = vector.multi_reduction <add>, %69, %cst_35 [1] : vector<32x256xf32> to vector<32xf32>
    %71 = vector.shape_cast %70 : vector<32xf32> to vector<32x1xf32>
    %72 = arith.mulf %69, %69 : vector<32x256xf32>
    %cst_36 = arith.constant dense<0.000000e+00> : vector<32xf32>
    %73 = vector.multi_reduction <add>, %72, %cst_36 [1] : vector<32x256xf32> to vector<32xf32>
    %74 = vector.shape_cast %73 : vector<32xf32> to vector<32x1xf32>
    %75 = tpu.concatenate %71, %74 in 1 : vector<32x1xf32>, vector<32x1xf32> -> vector<32x2xf32>
    %cst_37 = arith.constant dense<0.000000e+00> : vector<32x2xf32>
    %76 = tpu.matmul %23, %75, %cst_37 {dimension_numbers = #tpu.dot_dimension_numbers<[1], [0], [0], [1], [0, 0, 1, 1], [], []>} : vector<32x32xf32>, vector<32x2xf32>, vector<32x2xf32> -> vector<32x2xf32>
    %77 = vector.extract_strided_slice %76 {offsets = [0, 0], sizes = [32, 1], strides = [1, 1]} : vector<32x2xf32> to vector<32x1xf32>
    %cst_38 = arith.constant 4.8828125E-4 : f32
    %78 = vector.broadcast %cst_38 : f32 to vector<32x1xf32>
    %79 = arith.mulf %77, %78 : vector<32x1xf32>
    %80 = vector.extract_strided_slice %76 {offsets = [0, 1], sizes = [32, 1], strides = [1, 1]} : vector<32x2xf32> to vector<32x1xf32>
    %cst_39 = arith.constant 4.8828125E-4 : f32
    %81 = vector.broadcast %cst_39 : f32 to vector<32x1xf32>
    %82 = arith.mulf %80, %81 : vector<32x1xf32>
    %83 = arith.mulf %79, %79 : vector<32x1xf32>
    %84 = arith.subf %82, %83 : vector<32x1xf32>
    %cst_40 = arith.constant 9.99999974E-6 : f32
    %85 = vector.broadcast %cst_40 : f32 to vector<32x1xf32>
    %86 = arith.addf %84, %85 : vector<32x1xf32>
    %87 = math.rsqrt %86 : vector<32x1xf32>
    %88 = vector.broadcast %79 : vector<32x1xf32> to vector<32x256xf32>
    %89 = arith.subf %69, %88 : vector<32x256xf32>
    %90 = arith.mulf %87, %24 : vector<32x1xf32>
    %91 = vector.broadcast %90 : vector<32x1xf32> to vector<32x256xf32>
    %92 = arith.mulf %89, %91 : vector<32x256xf32>
    %93 = vector.broadcast %25 : vector<32x1xf32> to vector<32x256xf32>
    %94 = arith.addf %92, %93 : vector<32x256xf32>
    %cst_41 = arith.constant 0.000000e+00 : f32
    %95 = vector.broadcast %cst_41 : f32 to vector<32x256xf32>
    %96 = arith.maximumf %94, %95 : vector<32x256xf32>
    %c1 = arith.constant 1 : index
    %c0_42 = arith.constant 0 : index
    %c0_43 = arith.constant 0 : index
    %97 = vector.load %arg10[%c1, %c0_42, %c0_43] : memref<2x32x256xf32, #tpu.memory_space<vmem>>, vector<1x32x256xf32>
    %98 = vector.shape_cast %97 : vector<1x32x256xf32> to vector<32x256xf32>
    %99 = vector.shape_cast %96 : vector<32x256xf32> to vector<1x32x256xf32>
    tpu.vector_store %arg10[%c1, %c0_42, %c0_43], %99 {strides = array<i32>} : memref<2x32x256xf32, #tpu.memory_space<vmem>>, vector<1x32x256xf32>,
    return
  }
  func.func @transform_0(%arg0: i32) -> (i32, i32, i32) {
    %c0_i32 = arith.constant 0 : i32
    %c0_i32_0 = arith.constant 0 : i32
    %c0_i32_1 = arith.constant 0 : i32
    return %arg0, %c0_i32, %c0_i32_0 : i32, i32, i32
  }
  func.func @transform_1(%arg0: i32) -> (i32, i32) {
    %c0_i32 = arith.constant 0 : i32
    %c0_i32_0 = arith.constant 0 : i32
    %c0_i32_1 = arith.constant 0 : i32
    return %c0_i32, %c0_i32_0 : i32, i32
  }
  func.func @transform_2(%arg0: i32) -> (i32, i32) {
    %c0_i32 = arith.constant 0 : i32
    %c0_i32_0 = arith.constant 0 : i32
    %c0_i32_1 = arith.constant 0 : i32
    return %c0_i32, %c0_i32_0 : i32, i32
  }
  func.func @transform_3(%arg0: i32) -> (i32, i32) {
    %c0_i32 = arith.constant 0 : i32
    %c0_i32_0 = arith.constant 0 : i32
    %c0_i32_1 = arith.constant 0 : i32
    return %c0_i32, %c0_i32_0 : i32, i32
  }
  func.func @transform_4(%arg0: i32) -> (i32, i32) {
    %c0_i32 = arith.constant 0 : i32
    %c0_i32_0 = arith.constant 0 : i32
    %c0_i32_1 = arith.constant 0 : i32
    return %c0_i32, %c0_i32_0 : i32, i32
  }
  func.func @transform_5(%arg0: i32) -> (i32, i32) {
    %c0_i32 = arith.constant 0 : i32
    %c0_i32_0 = arith.constant 0 : i32
    %c0_i32_1 = arith.constant 0 : i32
    return %c0_i32, %c0_i32_0 : i32, i32
  }
  func.func @transform_6(%arg0: i32) -> (i32, i32) {
    %c0_i32 = arith.constant 0 : i32
    %c0_i32_0 = arith.constant 0 : i32
    %c0_i32_1 = arith.constant 0 : i32
    return %c0_i32, %c0_i32_0 : i32, i32
  }
  func.func @transform_7(%arg0: i32) -> (i32, i32) {
    %c0_i32 = arith.constant 0 : i32
    %c0_i32_0 = arith.constant 0 : i32
    %c0_i32_1 = arith.constant 0 : i32
    return %c0_i32, %c0_i32_0 : i32, i32
  }
  func.func @transform_8(%arg0: i32) -> (i32, i32) {
    %c0_i32 = arith.constant 0 : i32
    %c0_i32_0 = arith.constant 0 : i32
    %c0_i32_1 = arith.constant 0 : i32
    return %c0_i32, %c0_i32_0 : i32, i32
  }
  func.func @transform_9(%arg0: i32) -> (i32, i32, i32) {
    %c0_i32 = arith.constant 0 : i32
    %c0_i32_0 = arith.constant 0 : i32
    %c0_i32_1 = arith.constant 0 : i32
    return %arg0, %c0_i32, %c0_i32_0 : i32, i32, i32
  }
}

</mosaic_0001>

<bundles_post_ra>
// kernel: tpu_custom_call.1
= control target key start
LH: loop header
LB: loop body
LE: loop exit
PB: predicated region body
PF: predicated region fallthrough
CT: control target
= control target key end

     0   :  { %14 = vsyncpa [#allocation3], 0  ;;  %s1949_s0 = inlined_call_operand.vmem [shape: bf16[2,64,256], index: 0, kind: input, shape index: {}]   ;;  %s1950_s1 = inlined_call_operand.vmem [shape: f32[64,4], index: 1, kind: input, shape index: {}]   ;;  %s1951_s2 = inlined_call_operand.vmem [shape: f32[1,4], index: 2, kind: input, shape index: {}]   ;;  %s1952_s3 = inlined_call_operand.vmem [shape: f32[4,64], index: 3, kind: input, shape index: {}]   ;;  %s1953_s4 = inlined_call_operand.vmem [shape: f32[1,64], index: 4, kind: input, shape index: {}]   ;;  %s1954_s5 = inlined_call_operand.hbm [shape: f32[32,64], index: 5, kind: input, shape index: {}]   ;;  %s1955_s6 = inlined_call_operand.hbm [shape: f32[32,32], index: 6, kind: input, shape index: {}]   ;;  %s1956_s7 = inlined_call_operand.vmem [shape: f32[32,1], index: 7, kind: input, shape index: {}]   ;;  %s1957_s8 = inlined_call_operand.vmem [shape: f32[32,1], index: 8, kind: input, shape index: {}]   ;;  %s1958_s9 = inlined_call_operand.hbm [shape: f32[2,32,256], index: 9, kind: output, shape index: {}]  }
   0x1   :  { %15 = vsyncpa [#allocation6], 0 }
   0x2   :  { %16 = vsyncpa [#allocation4], 0  ;;  %s1486_s30 = smov [#allocation2]  }
   0x3   :  { %s32_s10 = sshll.u32 %s1486_s30, 4  ;;  %s33_s10 = int_to_ptr.vmem [resolvable:$true] %s32_s10 }
   0x4   :  { %s1428_s11 = scalar_lea.vmem %s33_s10, 512  ;;  %p1433_p1 = scmp.lt.s32.totalorder %s33_s10, %s33_s10 }
   0x5   :  { %p1429_p0 = scmp.ne.s32.totalorder %s33_s10, %s1428_s11  ;;  %p1434_p2 = scmp.lt.s32.totalorder %s1428_s11, %s1428_s11 }
   0x7   :  { %p1435_p3 = por %p1434_p2, %p1433_p1 }
   0x9   :  { %p1436_p4 = pnand %p1435_p3, %p1429_p0 }
   0xb   :  { %1439 = shalt.err (!%p1436_p4)
}
   0xc   :  { %s1487_s12 = smov 128   ;;  %s1488_s13 = smov 8  }
   0xd   :  { %38 = dma.hbm_to_vmem [thread:$0]  %s1954_s5, 512, %s33_s10, [#allocation3], %s1487_s12, %s1487_s12, %s1488_s13  }
   0xe   :  { %s1489_s16 = smov [#allocation5]  }
   0xf   :  { %s44_s17 = sshll.u32 %s1489_s16, 4  ;;  %s45_s17 = int_to_ptr.vmem [resolvable:$true] %s44_s17 }
  0x10   :  { %s1448_s18 = scalar_lea.vmem %s45_s17, 512  ;;  %p1453_p6 = scmp.lt.s32.totalorder %s45_s17, %s45_s17 }
  0x11   :  { %p1449_p5 = scmp.ne.s32.totalorder %s45_s17, %s1448_s18  ;;  %p1454_p7 = scmp.lt.s32.totalorder %s1448_s18, %s1448_s18 }
  0x13   :  { %p1455_p8 = por %p1454_p7, %p1453_p6 }
  0x15   :  { %p1456_p9 = pnand %p1455_p8, %p1449_p5 }
  0x17   :  { %1459 = shalt.err (!%p1456_p9)
}
  0x18   :  { %50 = dma.hbm_to_vmem [thread:$0]  %s1955_s6, 512, %s45_s17, [#allocation6], %s1487_s12, %s1487_s12, %s1488_s13  }
  0x19   :  { %1480 = dma.done.wait [#allocation3], 512  }
  0x1a   :  { %1481 = vsyncadd [#allocation3], 4294966784 }
  0x1b   :  { %1482 = dma.done.wait [#allocation6], 512  }
  0x1c   :  { %1483 = vsyncadd [#allocation6], 4294966784  ;;  %v1557_v0 = vld [vmem:[%s1949_s0 + $0x40] sm:$0xff]  ;;  %v1567_v2 = vld [vmem:[%s1949_s0 + $0x48] sm:$0xff]  ;;  %vm1491_vm0 = vmmov 0   ;;  %vm216_vm1 = vcmask 130112  }
  0x1d   :  { %v1562_v1 = vld [vmem:[%s1949_s0] sm:$0xff]  ;;  %v94_v3 = vunpack.c.l.bf16 %v1557_v0  ;;  %v95_v4 = vunpack.c.h.bf16 %v1557_v0  ;;  %v1576_v7 = vld [vmem:[%s1949_s0 + $0x8] sm:$0xff]  ;;  %v1581_v8 = vld [vmem:[%s1949_s0 + $0x50] sm:$0xff]  ;;  %v96_v9 = vunpack.c.l.bf16 %v1567_v2  ;;  %v97_v10 = vunpack.c.h.bf16 %v1567_v2 }
  0x1e   :  { %v78_v5 = vunpack.c.l.bf16 %v1562_v1  ;;  %v79_v6 = vunpack.c.h.bf16 %v1562_v1  ;;  %v80_v11 = vunpack.c.l.bf16 %v1576_v7  ;;  %v81_v12 = vunpack.c.h.bf16 %v1576_v7  ;;  %v1590_v13 = vld [vmem:[%s1949_s0 + $0x10] sm:$0xff]  ;;  %v1599_v22 = vld [vmem:[%s1949_s0 + $0x58] sm:$0xff]  ;;  %v1613_v30 = vld [vmem:[%s1949_s0 + $0x60] sm:$0xff] }
  0x1f   :  { %v134_v14 = vadd.f32 %v95_v4, %v94_v3  ;;  %v98_v16 = vunpack.c.l.bf16 %v1581_v8  ;;  %v99_v17 = vunpack.c.h.bf16 %v1581_v8  ;;  %v137_v18 = vadd.f32 %v97_v10, %v96_v9  ;;  %v1604_v23 = vld [vmem:[%s1949_s0 + $0x18] sm:$0xff]  ;;  %v1618_v31 = vld [vmem:[%s1949_s0 + $0x20] sm:$0xff]  ;;  %v1627_v38 = vld [vmem:[%s1949_s0 + $0x68] sm:$0xff] }
  0x20   :  { %v110_v15 = vadd.f32 %v79_v6, %v78_v5  ;;  %v113_v19 = vadd.f32 %v81_v12, %v80_v11  ;;  %v82_v20 = vunpack.c.l.bf16 %v1590_v13  ;;  %v83_v21 = vunpack.c.h.bf16 %v1590_v13  ;;  %v1632_v39 = vld [vmem:[%s1949_s0 + $0x28] sm:$0xff]  ;;  %v1641_v46 = vld [vmem:[%s1949_s0 + $0x70] sm:$0xff]  ;;  %v1655_v54 = vld [vmem:[%s1949_s0 + $0x78] sm:$0xff] }
  0x21   :  { %135 = vadd.xlane.f32.xlu1 %v134_v14  ;;  %v140_v24 = vadd.f32 %v99_v17, %v98_v16  ;;  %v100_v25 = vunpack.c.l.bf16 %v1599_v22  ;;  %v101_v27 = vunpack.c.h.bf16 %v1599_v22  ;;  %v84_v28 = vunpack.c.l.bf16 %v1604_v23  ;;  %v1646_v47 = vld [vmem:[%s1949_s0 + $0x30] sm:$0xff]  ;;  %v1660_v55 = vld [vmem:[%s1949_s0 + $0x38] sm:$0xff]  ;;  %v179_v6 = vld [vmem:[%s1950_s1 + $0x28] sm:$0xff] }
  0x22   :  { %111 = vadd.xlane.f32.xlu0 %v110_v15  ;;  %v116_v26 = vadd.f32 %v83_v21, %v82_v20  ;;  %v85_v29 = vunpack.c.h.bf16 %v1604_v23  ;;  %v102_v32 = vunpack.c.l.bf16 %v1613_v30  ;;  %v103_v33 = vunpack.c.h.bf16 %v1613_v30  ;;  %v181_v3 = vld [vmem:[%s1950_s1 + $0x38] sm:$0xff]  ;;  %v180_v5 = vld [vmem:[%s1950_s1 + $0x30] sm:$0xff]  ;;  %v178_v9 = vld [vmem:[%s1950_s1 + $0x20] sm:$0xff] }
  0x23   :  { %v143_v34 = vadd.f32 %v101_v27, %v100_v25  ;;  %v86_v36 = vunpack.c.l.bf16 %v1618_v31  ;;  %v87_v37 = vunpack.c.h.bf16 %v1618_v31  ;;  %v104_v41 = vunpack.c.l.bf16 %v1627_v38  ;;  %v177_v10 = vld [vmem:[%s1950_s1 + $0x18] sm:$0xff]  ;;  %v176_v11 = vld [vmem:[%s1950_s1 + $0x10] sm:$0xff]  ;;  %v175_v12 = vld [vmem:[%s1950_s1 + $0x8] sm:$0xff] }
  0x24   :  { %v119_v35 = vadd.f32 %v85_v29, %v84_v28  ;;  %v146_v40 = vadd.f32 %v103_v33, %v102_v32  ;;  %v105_v43 = vunpack.c.h.bf16 %v1627_v38  ;;  %v88_v44 = vunpack.c.l.bf16 %v1632_v39  ;;  %v174_v14 = vld [vmem:[%s1950_s1] sm:$0xff] }
  0x25   :  { %138 = vadd.xlane.f32.xlu1 %v137_v18  ;;  %v122_v42 = vadd.f32 %v87_v37, %v86_v36  ;;  %v89_v45 = vunpack.c.h.bf16 %v1632_v39  ;;  %v106_v48 = vunpack.c.l.bf16 %v1641_v46  ;;  %v107_v49 = vunpack.c.h.bf16 %v1641_v46 }
  0x26   :  { %114 = vadd.xlane.f32.xlu0 %v113_v19  ;;  %v149_v50 = vadd.f32 %v105_v43, %v104_v41  ;;  %v90_v52 = vunpack.c.l.bf16 %v1646_v47  ;;  %v91_v53 = vunpack.c.h.bf16 %v1646_v47  ;;  %v108_v57 = vunpack.c.l.bf16 %v1655_v54 }
  0x27   :  { %v125_v51 = vadd.f32 %v89_v45, %v88_v44  ;;  %v152_v56 = vadd.f32 %v107_v49, %v106_v48  ;;  %v109_v59 = vunpack.c.h.bf16 %v1655_v54  ;;  %v92_v60 = vunpack.c.l.bf16 %v1660_v55 }
  0x28   :  { %v128_v58 = vadd.f32 %v91_v53, %v90_v52  ;;  %v93_v61 = vunpack.c.h.bf16 %v1660_v55  ;;  %v1490_v4 = vmov 0.0   ;;  %v205_v19 = vlaneseq }
  0x29   :  { %141 = vadd.xlane.f32.xlu1 %v140_v24  ;;  %v155_v62 = vadd.f32 %v109_v59, %v108_v57  ;;  %1313 = vmatprep.subr.mxu0 %v1490_v4  ;;  %vm223_vm2 = vcmask 195712   ;;  %vm230_vm3 = vcmask 261312   ;;  %vm237_vm4 = vcmask 326912  }
  0x2a   :  { %117 = vadd.xlane.f32.xlu0 %v116_v26  ;;  %v131_v63 = vadd.f32 %v93_v61, %v92_v60  ;;  %1314 = vmatpush3.msra.mxu0 %v181_v3  ;;  %v206_v24 = vand.u32 127, %v205_v19  ;;  %v1701_v25 = vshrl.u32 %v205_v19, 7  ;;  %vm244_vm5 = vcmask 392512  }
  0x2b   :  { %1315 = vmatprep.subr.mxu0 %v1490_v4  ;;  %1329 = vmatprep.mubr.msk.f32.mxu0 %vm1491_vm0, %v1490_v4  ;;  %vm251_vm6 = vcmask 458112   ;;  %vm258_vm7 = vcmask 523712   ;;  %vm299_vm8 = vcmask 1041409   ;;  %vm301_vm9 = vcmask 523264  }
  0x2c   :  { %1316 = vmatpush3.msra.mxu0 %v180_v5  ;;  %v211_v28 = vadd.s32 4294967288, %v206_v24  ;;  %v218_v29 = vadd.s32 4294967280, %v206_v24  ;;  %v225_v32 = vadd.s32 4294967272, %v206_v24  ;;  %v232_v33 = vadd.s32 4294967264, %v206_v24 }
  0x2d   :  { %144 = vadd.xlane.f32.xlu1 %v143_v34  ;;  %1317 = vmatprep.subr.mxu0 %v1490_v4  ;;  %v209_v34 = vsub.s32 %v206_v24, %v1701_v25  ;;  %v239_v41 = vadd.s32 4294967256, %v206_v24  ;;  %v246_v43 = vadd.s32 4294967248, %v206_v24  ;;  %vm387_vm10 = vcmask 1043456  }
  0x2e   :  { %120 = vadd.xlane.f32.xlu0 %v119_v35  ;;  %1318 = vmatpush3.msra.mxu0 %v179_v6  ;;  %v214_v37 = vsub.s32 %v211_v28, %v1701_v25  ;;  %v235_v48 = vsub.s32 %v232_v33, %v1701_v25  ;;  %vm383_vm11 = vcmask 31744   ;;  %vm629_vm12 = vcmask 261120  }
  0x2f   :  { %1319 = vmatprep.subr.mxu0 %v1490_v4  ;;  %v242_v59 = vsub.s32 %v239_v41, %v1701_v25  ;;  %vm624_vm13 = vcmask 7168  }
  0x30   :  { %1320 = vmatpush3.msra.mxu0 %v178_v9 }
  0x31   :  { %147 = vadd.xlane.f32.xlu1 %v146_v40  ;;  %1321 = vmatprep.subr.mxu0 %v1490_v4  ;;  %v221_v40 = vsub.s32 %v218_v29, %v1701_v25 }
  0x32   :  { %123 = vadd.xlane.f32.xlu0 %v122_v42  ;;  %1322 = vmatpush3.msra.mxu0 %v177_v10  ;;  %v228_v42 = vsub.s32 %v225_v32, %v1701_v25 }
  0x33   :  { %1323 = vmatprep.subr.mxu0 %v1490_v4 }
  0x34   :  { %1324 = vmatpush3.msra.mxu0 %v176_v11 }
  0x35   :  { %150 = vadd.xlane.f32.xlu1 %v149_v50  ;;  %1325 = vmatprep.subr.mxu0 %v1490_v4 }
  0x36   :  { %126 = vadd.xlane.f32.xlu0 %v125_v51  ;;  %1326 = vmatpush3.msra.mxu0 %v175_v12 }
  0x37   :  { %1327 = vmatprep.subr.mxu0 %v1490_v4 }
  0x38   :  { %1328 = vmatpush3.msra.mxu0 %v174_v14 }
  0x39   :  { %153 = vadd.xlane.f32.xlu1 %v152_v56  ;;  %1332 = vmatprep.subr.mxu0 %v1490_v4 }
  0x3a   :  { %129 = vadd.xlane.f32.xlu0 %v128_v58 }
  0x3d   :  { %156 = vadd.xlane.f32.xlu1 %v155_v62  ;;  %v249_v62 = vsub.s32 %v246_v43, %v1701_v25 }
  0x3e   :  { %132 = vadd.xlane.f32.xlu0 %v131_v63  ;;  %v253_v63 = vadd.s32 4294967240, %v206_v24 }
  0xaa   :  { %v136_v15 = vpop.xlane.xlu1 %135 }
  0xab   :  { %v112_v16 = vpop.xlane.xlu0 %111  ;;  %v166_v49 = vmul.f32 0.00390625, %v136_v15 }
  0xac   :  { %v158_v50 = vmul.f32 0.00390625, %v112_v16 }
  0xad   :  { %v263_v10 = vrot.slane %v166_v49, %v209_v34 }
  0xae   :  { %v139_v17 = vpop.xlane.xlu1 %138  ;;  %v210_v11 = vrot.slane %v158_v50, %v209_v34 }
  0xaf   :  { %v115_v18 = vpop.xlane.xlu0 %114  ;;  %v167_v44 = vmul.f32 0.00390625, %v139_v17 }
  0xb0   :  { %v159_v45 = vmul.f32 0.00390625, %v115_v18 }
  0xb1   :  { %v267_v3 = vrot.slane %v167_v44, %v214_v37 }
  0xb2   :  { %v142_v20 = vpop.xlane.xlu1 %141  ;;  %v215_v5 = vrot.slane %v159_v45, %v214_v37 }
  0xb3   :  { %v118_v21 = vpop.xlane.xlu0 %117  ;;  %v168_v51 = vmul.f32 0.00390625, %v142_v20  ;;  %v268_v24 = vsel %vm216_vm1, %v267_v3, %v263_v10  ;;  %v1262_v10 = vcombine.low %v1618_v31, %v1632_v39 }
  0xb4   :  { %v160_v52 = vmul.f32 0.00390625, %v118_v21  ;;  %v217_v28 = vsel %vm216_vm1, %v215_v5, %v210_v11  ;;  %v1492_v11 = vmov 0  }
  0xb5   :  { %v272_v12 = vrot.slane %v168_v51, %v221_v40  ;;  %571 = vmatprep.mubr.bf16.mxu1 %v1492_v11  ;;  %1378 = vset.pattern.permute.xlu1 %v1492_v11 }
  0xb6   :  { %v145_v26 = vpop.xlane.xlu1 %144  ;;  %v222_v14 = vrot.slane %v160_v52, %v221_v40  ;;  %1377 = vset.pattern.permute.xlu0 %v1492_v11 }
  0xb7   :  { %v121_v27 = vpop.xlane.xlu0 %120  ;;  %v169_v57 = vmul.f32 0.00390625, %v145_v26  ;;  %v273_v33 = vsel %vm223_vm2, %v272_v12, %v268_v24  ;;  %v1261_v12 = vcombine.high %v1590_v13, %v1604_v23  ;;  %v1278_v24 = vcombine.low %v1641_v46, %v1655_v54 }
  0xb8   :  { %v161_v58 = vmul.f32 0.00390625, %v121_v27  ;;  %v256_v27 = vsub.s32 %v253_v63, %v1701_v25  ;;  %v224_v34 = vsel %vm223_vm2, %v222_v14, %v217_v28  ;;  %v1254_v14 = vld [vmem:[%s1953_s4] ss:$0 sm:$0xff]  ;;  %s1493_s4 = smov 1  }
  0xb9   :  { %v277_v17 = vrot.slane %v169_v57, %v228_v42 }
  0xba   :  { %v148_v35 = vpop.xlane.xlu1 %147  ;;  %v229_v18 = vrot.slane %v161_v58, %v228_v42 }
  0xbb   :  { %v124_v36 = vpop.xlane.xlu0 %123  ;;  %v170_v60 = vmul.f32 0.00390625, %v148_v35  ;;  %v278_v41 = vsel %vm230_vm3, %v277_v17, %v273_v33  ;;  %v470_v33 = vld [vmem:[#allocation2 + $0x18] sm:$0xff] }
  0xbc   :  { %v162_v61 = vmul.f32 0.00390625, %v124_v36  ;;  %v231_v42 = vsel %vm230_vm3, %v229_v18, %v224_v34  ;;  %v1276_v34 = vcombine.low %v1613_v30, %v1627_v38 }
  0xbd   :  { %v282_v21 = vrot.slane %v170_v60, %v235_v48  ;;  %v375_v60 = vld [vmem:[%s1952_s3] sm:$0xf] }
  0xbe   :  { %v151_v53 = vpop.xlane.xlu1 %150  ;;  %v236_v26 = vrot.slane %v162_v61, %v235_v48  ;;  %v1252_v61 = vld [vmem:[%s1951_s2] ss:$0 sm:$0xff] }
  0xbf   :  { %v127_v56 = vpop.xlane.xlu0 %126  ;;  %v171_v6 = vmul.f32 0.00390625, %v151_v53  ;;  %v283_v45 = vsel %vm237_vm4, %v282_v21, %v278_v41 }
  0xc0   :  { %v163_v9 = vmul.f32 0.00390625, %v127_v56  ;;  %v238_v48 = vsel %vm237_vm4, %v236_v26, %v231_v42 }
  0xc1   :  { %v287_v29 = vrot.slane %v171_v6, %v242_v59  ;;  %v1265_v6 = vcombine.high %v1646_v47, %v1660_v55 }
  0xc2   :  { %v154_v15 = vpop.xlane.xlu1 %153  ;;  %v243_v32 = vrot.slane %v163_v9, %v242_v59  ;;  %v1263_v9 = vcombine.high %v1618_v31, %v1632_v39  ;;  %v1258_v31 = vcombine.low %v1562_v1, %v1576_v7  ;;  %v1279_v39 = vcombine.high %v1641_v46, %v1655_v54 }
  0xc3   :  { %v130_v16 = vpop.xlane.xlu0 %129  ;;  %v172_v19 = vmul.f32 0.00390625, %v154_v15  ;;  %v288_v49 = vsel %vm244_vm5, %v287_v29, %v283_v45  ;;  %547 = vmatprep.subr.bf16.mxu1 %v1265_v6  ;;  %v1277_v29 = vcombine.high %v1613_v30, %v1627_v38  ;;  %v1275_v46 = vcombine.high %v1581_v8, %v1599_v22 }
  0xc4   :  { %v164_v20 = vmul.f32 0.00390625, %v130_v16  ;;  %v245_v50 = vsel %vm244_vm5, %v243_v32, %v238_v48  ;;  %v469_v32 = vld [vmem:[#allocation2 + $0x10] sm:$0xff]  ;;  %v1274_v54 = vcombine.low %v1581_v8, %v1599_v22  ;;  %v1273_v30 = vcombine.high %v1557_v0, %v1567_v2 }
  0xc5   :  { %v292_v35 = vrot.slane %v172_v19, %v249_v62  ;;  %v467_v19 = vld [vmem:[#allocation2] sm:$0xff]  ;;  %v1272_v38 = vcombine.low %v1557_v0, %v1567_v2 }
  0xc6   :  { %v250_v36 = vrot.slane %v164_v20, %v249_v62  ;;  %v157_v37 = vpop.xlane.xlu1 %156  ;;  %v468_v20 = vld [vmem:[#allocation2 + $0x8] sm:$0xff] }
  0xc7   :  { %v133_v40 = vpop.xlane.xlu0 %132  ;;  %v173_v43 = vmul.f32 0.00390625, %v157_v37  ;;  %v293_v53 = vsel %vm251_vm6, %v292_v35, %v288_v49  ;;  %v885_v35 = vsub.s32 1, %v1701_v25 }
  0xc8   :  { %v165_v44 = vmul.f32 0.00390625, %v133_v40  ;;  %v252_v56 = vsel %vm251_vm6, %v250_v36, %v245_v50 }
  0xc9   :  { %v297_v51 = vrot.slane %v173_v43, %v256_v27 }
  0xca   :  { %v257_v52 = vrot.slane %v165_v44, %v256_v27 }
  0xcb   :  { %v298_v58 = vsel %vm258_vm7, %v297_v51, %v293_v53 }
  0xcc   :  { %v259_v57 = vsel %vm258_vm7, %v257_v52, %v252_v56 }
  0xcd   :  { %v300_v59 = vsel %vm299_vm8, %v298_v58, %v259_v57 }
  0xce   :  { %1330 = vmatmul.mubr.msk.f32.vlgmr.msra.gmra.mxu0 %vm301_vm9, %v300_v59 }
  0xcf   :  { %1334 = vmatprep.mubr.msk.f32.mxu0 %vm1491_vm0, %v1490_v4  ;;  %1333 = vmatpush3.msk.msra.mxu0 %vm387_vm10, %v375_v60  ;;  %v1264_v4 = vcombine.low %v1646_v47, %v1660_v55  ;;  %v1260_v47 = vcombine.low %v1590_v13, %v1604_v23  ;;  %v1259_v55 = vcombine.high %v1562_v1, %v1576_v7  ;;  %v485_v1 = vsub.s32 0, %v1701_v25 }
  0xd1   :  { %548 = vmatpush1.bf16.msra.mxu1 %v1264_v4 }
  0xd2   :  { %549 = vmatprep.subr.bf16.mxu1 %v1263_v9 }
  0xd5   :  { %550 = vmatpush1.bf16.msra.mxu1 %v1262_v10 }
  0xd6   :  { %551 = vmatprep.subr.bf16.mxu1 %v1261_v12 }
  0xd9   :  { %552 = vmatpush1.bf16.msra.mxu1 %v1260_v47 }
  0xda   :  { %553 = vmatprep.subr.bf16.mxu1 %v1259_v55 }
  0xdd   :  { %554 = vmatpush1.bf16.msra.mxu1 %v1258_v31 }
  0xde   :  { %947 = vmatprep.subr.bf16.mxu1 %v1279_v39 }
 0x18e   :  { %v370_v62 = vpop.f32.mrf.mxu0 }
 0x18f   :  { %v371_v63 = vadd.f32 %v1252_v61, %v370_v62 }
 0x190   :  { %v1331_v3 = vpop.f32.mrf.mxu0 }
 0x191   :  { %v374_v5 = vmax.f32 %v371_v63, 0.0 }
 0x193   :  { %1335 = vmatmul.mubr.msk.f32.vlgmr.msra.gmra.mxu0 %vm383_vm11, %v374_v5 }
 0x253   :  { %v457_v15 = vpop.f32.mrf.mxu0 }
 0x254   :  { %v458_v13 = vadd.f32 %v1254_v14, %v457_v15 }
 0x255   :  { %v1336_v23 = vpop.f32.mrf.mxu0 }
 0x256   :  { %v1257_v16 = vmul.f32 -1.442695, %v458_v13 }
 0x258   :  { %1400 = vpow2.f32 %v1257_v16 }
 0x265   :  { %v1401_v17 = vpop.eup %1400 }
 0x266   :  { %v464_v18 = vadd.f32 1.0, %v1401_v17 }
 0x268   :  { %1402 = vrcp.f32 %v464_v18 }
 0x275   :  { %v1403_v7 = vpop.eup %1402 }
 0x276   :  { %v486_v21 = vrot.slane %v1403_v7, %v485_v1  ;;  %v886_v40 = vrot.slane %v1403_v7, %v885_v35 }
 0x278   :  { %v487_v26 = vmul.f32 %v486_v21, %v467_v19  ;;  %v488_v27 = vmul.f32 %v486_v21, %v468_v20  ;;  %v489_v36 = vmul.f32 %v486_v21, %v469_v32  ;;  %v490_v37 = vmul.f32 %v486_v21, %v470_v33 }
 0x279   :  { %v887_v25 = vmul.f32 %v886_v40, %v467_v19  ;;  %v888_v42 = vmul.f32 %v886_v40, %v468_v20  ;;  %v889_v8 = vmul.f32 %v886_v40, %v469_v32  ;;  %v890_v22 = vmul.f32 %v886_v40, %v470_v33  ;;  %v471_v32 = vld [vmem:[#allocation5] sm:$0xff] }
 0x27a   :  { %v491_v28 = vpack.c.bf16 %v488_v27, %v487_v26  ;;  %v492_v41 = vpack.c.bf16 %v490_v37, %v489_v36  ;;  %1345 = vmatprep.mubr.msk.f32.mxu0 %vm629_vm12, %v471_v32 }
 0x27b   :  { %v891_v43 = vpack.c.bf16 %v888_v42, %v887_v25  ;;  %v892_v44 = vpack.c.bf16 %v890_v22, %v889_v8  ;;  %v472_v22 = vld [vmem:[#allocation5 + $0x8] sm:$0xff] }
 0x27c   :  { %1266 = vmatmul.mubr.msk.bf16.vlgmr.msra.gmra.mxu1 %vm301_vm9, %v491_v28 }
 0x27d   :  { %948 = vmatpush1.bf16.msra.mxu1 %v1278_v24  ;;  %581 = vmatprep.mubr.bf16.mxu1 %v1492_v11 }
 0x27e   :  { %949 = vmatprep.subr.bf16.mxu1 %v1277_v29 }
 0x281   :  { %950 = vmatpush1.bf16.msra.mxu1 %v1276_v34 }
 0x282   :  { %951 = vmatprep.subr.bf16.mxu1 %v1275_v46 }
 0x284   :  { %1267 = vmatmul.mubr.msk.bf16.gmra.mxu1 %vm301_vm9, %v492_v41 }
 0x285   :  { %952 = vmatpush1.bf16.msra.mxu1 %v1274_v54  ;;  %971 = vmatprep.mubr.bf16.mxu1 %v1492_v11 }
 0x286   :  { %953 = vmatprep.subr.bf16.mxu1 %v1273_v30 }
 0x289   :  { %954 = vmatpush1.bf16.msra.mxu1 %v1272_v38 }
 0x28c   :  { %1280 = vmatmul.mubr.msk.bf16.vlgmr.msra.gmra.mxu1 %vm301_vm9, %v891_v43 }
 0x28d   :  { %981 = vmatprep.mubr.bf16.mxu1 %v1492_v11 }
 0x294   :  { %1281 = vmatmul.mubr.msk.bf16.gmra.mxu1 %vm301_vm9, %v892_v44  ;;  %v473_v44 = vld [vmem:[#allocation5 + $0x10] sm:$0xff] }
 0x33c   :  { %v1779_v45 = vpop.f32.mrf.mxu1 }
 0x33d   :  { %v604_v2 = vmul.f32 %v1779_v45, %v1779_v45 }
 0x33e   :  { %v1781_v48 = vpop.f32.mrf.mxu1 }
 0x33f   :  { %v592_v0 = vadd.f32 %v1781_v48, %v1779_v45  ;;  %v605_v49 = vmul.f32 %v1781_v48, %v1781_v48 }
 0x340   :  { %v1789_v50 = vpop.f32.mrf.mxu1 }
 0x341   :  { %593 = vadd.xlane.f32.xlu0 %v592_v0  ;;  %v612_v51 = vadd.f32 %v605_v49, %v604_v2  ;;  %v606_v56 = vmul.f32 %v1789_v50, %v1789_v50  ;;  %v474_v2 = vld [vmem:[#allocation5 + $0x18] sm:$0xff] }
 0x342   :  { %v1791_v52 = vpop.f32.mrf.mxu1 }
 0x343   :  { %613 = vadd.xlane.f32.xlu1 %v612_v51  ;;  %v595_v53 = vadd.f32 %v1791_v52, %v1789_v50  ;;  %v607_v57 = vmul.f32 %v1791_v52, %v1791_v52 }
 0x344   :  { %v1799_v58 = vpop.f32.mrf.mxu1 }
 0x345   :  { %596 = vadd.xlane.f32.xlu0 %v595_v53  ;;  %v615_v59 = vadd.f32 %v607_v57, %v606_v56  ;;  %v608_v62 = vmul.f32 %v1799_v58, %v1799_v58 }
 0x346   :  { %v1801_v60 = vpop.f32.mrf.mxu1 }
 0x347   :  { %616 = vadd.xlane.f32.xlu1 %v615_v59  ;;  %v598_v61 = vadd.f32 %v1801_v60, %v1799_v58  ;;  %v609_v63 = vmul.f32 %v1801_v60, %v1801_v60 }
 0x348   :  { %v1809_v3 = vpop.f32.mrf.mxu1 }
 0x349   :  { %599 = vadd.xlane.f32.xlu0 %v598_v61  ;;  %v618_v5 = vadd.f32 %v609_v63, %v608_v62  ;;  %v610_v9 = vmul.f32 %v1809_v3, %v1809_v3 }
 0x34a   :  { %v1811_v6 = vpop.f32.mrf.mxu1 }
 0x34b   :  { %619 = vadd.xlane.f32.xlu1 %v618_v5  ;;  %v601_v4 = vadd.f32 %v1811_v6, %v1809_v3  ;;  %v611_v10 = vmul.f32 %v1811_v6, %v1811_v6 }
 0x34c   :  { %v1819_v12 = vpop.f32.mrf.mxu1 }
 0x34d   :  { %602 = vadd.xlane.f32.xlu0 %v601_v4  ;;  %v621_v47 = vadd.f32 %v611_v10, %v610_v9  ;;  %v1004_v34 = vmul.f32 %v1819_v12, %v1819_v12 }
 0x34e   :  { %v1821_v55 = vpop.f32.mrf.mxu1 }
 0x34f   :  { %622 = vadd.xlane.f32.xlu1 %v621_v47  ;;  %v1005_v29 = vmul.f32 %v1821_v55, %v1821_v55  ;;  %v992_v33 = vadd.f32 %v1821_v55, %v1819_v12 }
 0x350   :  { %v1823_v31 = vpop.f32.mrf.mxu1 }
 0x351   :  { %v1006_v24 = vmul.f32 %v1823_v31, %v1823_v31  ;;  %v1012_v35 = vadd.f32 %v1005_v29, %v1004_v34 }
 0x352   :  { %v1825_v39 = vpop.f32.mrf.mxu1 }
 0x353   :  { %v1007_v26 = vmul.f32 %v1825_v39, %v1825_v39  ;;  %v995_v27 = vadd.f32 %v1825_v39, %v1823_v31 }
 0x354   :  { %v1827_v14 = vpop.f32.mrf.mxu1 }
 0x355   :  { %v1008_v23 = vmul.f32 %v1827_v14, %v1827_v14  ;;  %v1015_v28 = vadd.f32 %v1007_v26, %v1006_v24 }
 0x356   :  { %v1829_v15 = vpop.f32.mrf.mxu1 }
 0x357   :  { %v998_v13 = vadd.f32 %v1829_v15, %v1827_v14  ;;  %v1009_v16 = vmul.f32 %v1829_v15, %v1829_v15 }
 0x358   :  { %v1837_v17 = vpop.f32.mrf.mxu1 }
 0x359   :  { %999 = vadd.xlane.f32.xlu0 %v998_v13  ;;  %v1018_v18 = vadd.f32 %v1009_v16, %v1008_v23  ;;  %v1010_v20 = vmul.f32 %v1837_v17, %v1837_v17 }
 0x35a   :  { %v1839_v1 = vpop.f32.mrf.mxu1 }
 0x35b   :  { %v1011_v7 = vmul.f32 %v1839_v1, %v1839_v1  ;;  %1019 = vadd.xlane.f32.xlu1 %v1018_v18  ;;  %v1001_v19 = vadd.f32 %v1839_v1, %v1837_v17 }
 0x35d   :  { %1002 = vadd.xlane.f32.xlu0 %v1001_v19  ;;  %v1021_v21 = vadd.f32 %v1011_v7, %v1010_v20 }
 0x35f   :  { %1022 = vadd.xlane.f32.xlu1 %v1021_v21 }
 0x361   :  { %996 = vadd.xlane.f32.xlu0 %v995_v27 }
 0x363   :  { %1016 = vadd.xlane.f32.xlu1 %v1015_v28 }
 0x365   :  { %993 = vadd.xlane.f32.xlu0 %v992_v33 }
 0x367   :  { %1013 = vadd.xlane.f32.xlu1 %v1012_v35 }
 0x3ca   :  { %v594_v36 = vpop.xlane.xlu0 %593 }
 0x3cc   :  { %v614_v37 = vpop.xlane.xlu1 %613 }
 0x3cd   :  { %v625_v8 = vsel %vm624_vm13, %v594_v36, %v614_v37 }
 0x3ce   :  { %v597_v46 = vpop.xlane.xlu0 %596 }
 0x3d0   :  { %v617_v54 = vpop.xlane.xlu1 %616 }
 0x3d1   :  { %v626_v43 = vsel %vm624_vm13, %v597_v46, %v617_v54 }
 0x3d2   :  { %v600_v40 = vpop.xlane.xlu0 %599 }
 0x3d4   :  { %v620_v41 = vpop.xlane.xlu1 %619 }
 0x3d5   :  { %v627_v42 = vsel %vm624_vm13, %v600_v40, %v620_v41  ;;  %v476_v40 = vld [vmem:[%s1956_s7 + $0x8] sm:$0xff]  ;;  %v475_v41 = vld [vmem:[%s1956_s7] sm:$0xff] }
 0x3d6   :  { %v603_v30 = vpop.xlane.xlu0 %602 }
 0x3d8   :  { %v623_v38 = vpop.xlane.xlu1 %622 }
 0x3d9   :  { %v628_v25 = vsel %vm624_vm13, %v603_v30, %v623_v38  ;;  %v478_v30 = vld [vmem:[%s1956_s7 + $0x18] sm:$0xff]  ;;  %v477_v38 = vld [vmem:[%s1956_s7 + $0x10] sm:$0xff] }
 0x3da   :  { %1337 = vmatprep.subr.mxu0 %v628_v25 }
 0x3db   :  { %1338 = vmatpush3.msra.mxu0 %v628_v25  ;;  %v480_v25 = vld [vmem:[%s1957_s8 + $0x8] sm:$0xff] }
 0x3dc   :  { %1339 = vmatprep.subr.mxu0 %v627_v42 }
 0x3dd   :  { %1340 = vmatpush3.msra.mxu0 %v627_v42  ;;  %v479_v42 = vld [vmem:[%s1957_s8] sm:$0xff] }
 0x3de   :  { %1341 = vmatprep.subr.mxu0 %v626_v43 }
 0x3df   :  { %1342 = vmatpush3.msra.mxu0 %v626_v43  ;;  %v1494_v43 = vmov 1  }
 0x3e0   :  { %1343 = vmatprep.subr.mxu0 %v625_v8 }
 0x3e1   :  { %1344 = vmatpush3.msra.mxu0 %v625_v8 }
 0x3e2   :  { %1346 = vmatmul.mubr.msk.f32.vlgmr.msra.gmra.mxu0 %vm629_vm12, %v472_v22  ;;  %v1000_v0 = vpop.xlane.xlu0 %999 }
 0x3e3   :  { %1348 = vmatprep.mubr.msk.f32.mxu0 %vm629_vm12, %v473_v44 }
 0x3e4   :  { %v1020_v49 = vpop.xlane.xlu1 %1019 }
 0x3e5   :  { %v1026_v59 = vsel %vm624_vm13, %v1000_v0, %v1020_v49 }
 0x3e6   :  { %1349 = vmatmul.mubr.msk.f32.gmra.mxu0 %vm629_vm12, %v474_v2  ;;  %v1003_v51 = vpop.xlane.xlu0 %1002 }
 0x3e7   :  { %1359 = vmatprep.mubr.msk.f32.mxu0 %vm629_vm12, %v471_v32 }
 0x3e8   :  { %v1023_v53 = vpop.xlane.xlu1 %1022 }
 0x3e9   :  { %v1027_v56 = vsel %vm624_vm13, %v1003_v51, %v1023_v53 }
 0x3ea   :  { %1351 = vmatprep.subr.mxu0 %v1027_v56  ;;  %v997_v57 = vpop.xlane.xlu0 %996 }
 0x3eb   :  { %1352 = vmatpush3.msra.mxu0 %v1027_v56 }
 0x3ec   :  { %v1017_v61 = vpop.xlane.xlu1 %1016  ;;  %1353 = vmatprep.subr.mxu0 %v1026_v59 }
 0x3ed   :  { %1354 = vmatpush3.msra.mxu0 %v1026_v59  ;;  %v1025_v62 = vsel %vm624_vm13, %v997_v57, %v1017_v61 }
 0x3ee   :  { %1355 = vmatprep.subr.mxu0 %v1025_v62  ;;  %v994_v63 = vpop.xlane.xlu0 %993 }
 0x3ef   :  { %1356 = vmatpush3.msra.mxu0 %v1025_v62 }
 0x3f0   :  { %v1014_v5 = vpop.xlane.xlu1 %1013 }
 0x3f1   :  { %v1024_v4 = vsel %vm624_vm13, %v994_v63, %v1014_v5 }
 0x3f2   :  { %1357 = vmatprep.subr.mxu0 %v1024_v4 }
 0x3f3   :  { %1358 = vmatpush3.msra.mxu0 %v1024_v4 }
 0x3f4   :  { %1360 = vmatmul.mubr.msk.f32.vlgmr.msra.gmra.mxu0 %vm629_vm12, %v472_v22 }
 0x3f5   :  { %1362 = vmatprep.mubr.msk.f32.mxu0 %vm629_vm12, %v473_v44 }
 0x3f8   :  { %1363 = vmatmul.mubr.msk.f32.gmra.mxu0 %vm629_vm12, %v474_v2 }
 0x4a2   :  { %v1347_v9 = vpop.f32.mrf.mxu0 }
 0x4a3   :  { %v728_v10 = vmul.f32 0.00048828125, %v1347_v9 }
 0x4a4   :  { %v708_v47 = vpop.f32.mrf.mxu0 }
 0x4a5   :  { %v727_v13 = vmul.f32 0.00048828125, %v708_v47  ;;  %v732_v23 = vmul.f32 %v728_v10, %v728_v10 }
 0x4a6   :  { %v1350_v16 = vpop.f32.mrf.mxu0 }
 0x4a7   :  { %v730_v18 = vmul.f32 0.00048828125, %v1350_v16  ;;  %741 = vrot.lane.b32.xlu1 %v732_v23, %s1493_s4  ;;  %v731_v7 = vmul.f32 %v727_v13, %v727_v13 }
 0x4a8   :  { %v718_v19 = vpop.f32.mrf.mxu0 }
 0x4a9   :  { %739 = vrot.lane.b32.xlu0 %v731_v7, %s1493_s4  ;;  %v729_v20 = vmul.f32 0.00048828125, %v718_v19  ;;  %v734_v21 = vmul.f32 %v730_v18, %v730_v18 }
 0x4ab   :  { %745 = vrot.lane.b32.xlu1 %v734_v21, %s1493_s4  ;;  %v733_v26 = vmul.f32 %v729_v20, %v729_v20 }
 0x4af   :  { %743 = vrot.lane.b32.xlu1 %v733_v26, %s1493_s4 }
 0x4b4   :  { %v1361_v27 = vpop.f32.mrf.mxu0 }
 0x4b5   :  { %v1114_v24 = vmul.f32 0.00048828125, %v1361_v27 }
 0x4b6   :  { %v1094_v28 = vpop.f32.mrf.mxu0 }
 0x4b7   :  { %v1113_v29 = vmul.f32 0.00048828125, %v1094_v28  ;;  %v1118_v32 = vmul.f32 %v1114_v24, %v1114_v24 }
 0x4b8   :  { %v1364_v33 = vpop.f32.mrf.mxu0 }
 0x4b9   :  { %v1116_v34 = vmul.f32 0.00048828125, %v1364_v33  ;;  %1127 = vrot.lane.b32.xlu1 %v1118_v32, %s1493_s4  ;;  %v1117_v35 = vmul.f32 %v1113_v29, %v1113_v29 }
 0x4ba   :  { %v1104_v36 = vpop.f32.mrf.mxu0 }
 0x4bb   :  { %v1880_v37 = vmul.f32 0.00048828125, %v1104_v36  ;;  %1125 = vrot.lane.b32.xlu0 %v1117_v35, %s1493_s4  ;;  %v1120_v46 = vmul.f32 %v1116_v34, %v1116_v34 }
 0x4bd   :  { %1131 = vrot.lane.b32.xlu1 %v1120_v46, %s1493_s4  ;;  %v1119_v54 = vmul.f32 %v1880_v37, %v1880_v37 }
 0x4bf   :  { %1129 = vrot.lane.b32.xlu0 %v1119_v54, %s1493_s4 }
 0x4c1   :  { %797 = vrot.lane.b32.xlu1 %v476_v40, %s1493_s4  ;;  %v482_v40 = vld [vmem:[%s1957_s8 + $0x18] sm:$0xff] }
 0x4c3   :  { %795 = vrot.lane.b32.xlu0 %v475_v41, %s1493_s4 }
 0x4c5   :  { %801 = vrot.lane.b32.xlu1 %v478_v30, %s1493_s4 }
 0x4c7   :  { %799 = vrot.lane.b32.xlu0 %v477_v38, %s1493_s4 }
 0x4c9   :  { %770 = vperm.xlu1 %1378, %v728_v10  }
 0x4cb   :  { %765 = vperm.xlu0 %1377, %v727_v13  }
 0x4cd   :  { %775 = vperm.xlu1 %1378, %v729_v20  }
 0x4cf   :  { %780 = vperm.xlu0 %1377, %v730_v18  }
 0x4d1   :  { %1156 = vperm.xlu1 %1378, %v1114_v24  }
 0x4d3   :  { %1151 = vperm.xlu0 %1377, %v1113_v29  }
 0x4d5   :  { %1161 = vperm.xlu1 %1378, %v1880_v37  }
 0x4d7   :  { %1166 = vperm.xlu0 %1377, %v1116_v34  }
 0x4d9   :  { %846 = vperm.xlu1 %1378, %v480_v25  }
 0x4db   :  { %841 = vperm.xlu0 %1377, %v479_v42   ;;  %v481_v42 = vld [vmem:[%s1957_s8 + $0x10] sm:$0xff]  ;;  %s1495_s8 = smov [#allocation7]  }
 0x4dc   :  { %s1239_s16 = sshll.u32 %s1495_s8, 4  ;;  %s1240_s16 = int_to_ptr.vmem [resolvable:$true] %s1239_s16 }
 0x4dd   :  { %1380 = vset.pattern.permute.xlu1 %v1494_v43  ;;  %s1460_s17 = scalar_lea.vmem %s1240_s16, 2048  ;;  %p1465_p11 = scmp.lt.s32.totalorder %s1240_s16, %s1240_s16 }
 0x4de   :  { %p1461_p10 = scmp.ne.s32.totalorder %s1240_s16, %s1460_s17  ;;  %p1466_p12 = scmp.lt.s32.totalorder %s1460_s17, %s1460_s17 }
 0x4df   :  { %1379 = vset.pattern.permute.xlu0 %v1494_v43 }
 0x4e0   :  { %p1467_p13 = por %p1466_p12, %p1465_p11 }
 0x4e2   :  { %p1468_p0 = pnand %p1467_p13, %p1461_p10 }
 0x519   :  { %v742_v8 = vpop.permute.xlu1 %741 }
 0x51a   :  { %v752_v44 = vsub.f32 %v728_v10, %v742_v8 }
 0x51b   :  { %v740_v22 = vpop.permute.xlu0 %739 }
 0x51c   :  { %v751_v2 = vsub.f32 %v727_v13, %v740_v22  ;;  %v756_v49 = vadd.f32 1e-05, %v752_v44 }
 0x51d   :  { %v746_v0 = vpop.permute.xlu1 %745 }
 0x51e   :  { %v755_v51 = vadd.f32 1e-05, %v751_v2  ;;  %v754_v53 = vsub.f32 %v730_v18, %v746_v0  ;;  %1404 = vrsqrt.f32 %v756_v49 }
 0x520   :  { %1406 = vrsqrt.f32 %v755_v51  ;;  %v758_v59 = vadd.f32 1e-05, %v754_v53 }
 0x521   :  { %v744_v56 = vpop.permute.xlu1 %743 }
 0x522   :  { %v753_v57 = vsub.f32 %v729_v20, %v744_v56  ;;  %1408 = vrsqrt.f32 %v758_v59 }
 0x524   :  { %v757_v61 = vadd.f32 1e-05, %v753_v57 }
 0x526   :  { %1410 = vrsqrt.f32 %v757_v61 }
 0x52b   :  { %v1128_v62 = vpop.permute.xlu1 %1127  ;;  %v1405_v7 = vpop.eup %1404 }
 0x52c   :  { %v1138_v63 = vsub.f32 %v1114_v24, %v1128_v62 }
 0x52d   :  { %v1126_v5 = vpop.permute.xlu0 %1125  ;;  %v1407_v21 = vpop.eup %1406 }
 0x52e   :  { %v1142_v4 = vadd.f32 1e-05, %v1138_v63  ;;  %v1137_v9 = vsub.f32 %v1113_v29, %v1126_v5 }
 0x52f   :  { %v1132_v47 = vpop.permute.xlu1 %1131  ;;  %v1409_v29 = vpop.eup %1408 }
 0x530   :  { %1412 = vrsqrt.f32 %v1142_v4  ;;  %v1141_v10 = vadd.f32 1e-05, %v1137_v9  ;;  %v1140_v13 = vsub.f32 %v1116_v34, %v1132_v47 }
 0x531   :  { %v1130_v23 = vpop.permute.xlu0 %1129 }
 0x532   :  { %1414 = vrsqrt.f32 %v1141_v10  ;;  %v1144_v16 = vadd.f32 1e-05, %v1140_v13  ;;  %v1139_v18 = vsub.f32 %v1880_v37, %v1130_v23 }
 0x533   :  { %v798_v19 = vpop.permute.xlu1 %797  ;;  %v1411_v34 = vpop.eup %1410 }
 0x534   :  { %v808_v20 = vmul.f32 %v1405_v7, %v798_v19  ;;  %1416 = vrsqrt.f32 %v1144_v16  ;;  %v1143_v27 = vadd.f32 1e-05, %v1139_v18 }
 0x535   :  { %v796_v26 = vpop.permute.xlu0 %795 }
 0x536   :  { %v807_v24 = vmul.f32 %v1407_v21, %v796_v26  ;;  %818 = vperm.xlu0 %1379, %v808_v20   ;;  %1418 = vrsqrt.f32 %v1143_v27 }
 0x537   :  { %v802_v28 = vpop.permute.xlu1 %801 }
 0x538   :  { %813 = vperm.xlu1 %1380, %v807_v24   ;;  %v810_v32 = vmul.f32 %v1409_v29, %v802_v28 }
 0x539   :  { %v800_v33 = vpop.permute.xlu0 %799 }
 0x53a   :  { %v809_v37 = vmul.f32 %v1411_v34, %v800_v33 }
 0x53c   :  { %828 = vperm.xlu1 %1380, %v810_v32  }
 0x53d   :  { %v1413_v35 = vpop.eup %1412 }
 0x53e   :  { %v1178_v36 = vmul.f32 %v1413_v35, %v798_v19 }
 0x53f   :  { %v1415_v46 = vpop.eup %1414 }
 0x540   :  { %1188 = vperm.xlu0 %1379, %v1178_v36   ;;  %823 = vperm.xlu1 %1380, %v809_v37   ;;  %v1177_v54 = vmul.f32 %v1415_v46, %v796_v26 }
 0x541   :  { %v1417_v41 = vpop.eup %1416 }
 0x542   :  { %v1180_v30 = vmul.f32 %v1417_v41, %v802_v28 }
 0x543   :  { %v1419_v38 = vpop.eup %1418 }
 0x544   :  { %1382 = vset.pattern.permute.xlu0 %v1492_v11  ;;  %1183 = vperm.xlu1 %1380, %v1177_v54   ;;  %v1179_v25 = vmul.f32 %v1419_v38, %v800_v33  ;;  %v771_v22 = vpop.permute.xlu1 %770 }
 0x545   :  { %856 = vperm.xlu0 %1382, %v482_v40   ;;  %v785_v57 = vsub.f32 %v1789_v50, %v771_v22  ;;  %v786_v59 = vsub.f32 %v1791_v52, %v771_v22 }
 0x546   :  { %v766_v8 = vpop.permute.xlu0 %765 }
 0x547   :  { %v784_v62 = vsub.f32 %v1781_v48, %v766_v8 }
 0x548   :  { %1198 = vperm.xlu1 %1380, %v1180_v30   ;;  %v1922_v0 = vpop.permute.xlu1 %775 }
 0x549   :  { %1383 = vset.pattern.permute.xlu0 %v1494_v43 }
 0x54a   :  { %v781_v44 = vpop.permute.xlu0 %780 }
 0x54b   :  { %v789_v24 = vsub.f32 %v1809_v3, %v781_v44  ;;  %v790_v28 = vsub.f32 %v1811_v6, %v781_v44 }
 0x54c   :  { %1193 = vperm.xlu1 %1380, %v1179_v25   ;;  %v1157_v49 = vpop.permute.xlu1 %1156 }
 0x54d   :  { %v1172_v48 = vsub.f32 %v1825_v39, %v1157_v49 }
 0x54e   :  { %v1152_v2 = vpop.permute.xlu0 %1151 }
 0x54f   :  { %v1169_v29 = vsub.f32 %v1819_v12, %v1152_v2  ;;  %v1170_v32 = vsub.f32 %v1821_v55, %v1152_v2 }
 0x550   :  { %1381 = vset.pattern.permute.xlu1 %v1492_v11  ;;  %v1924_v53 = vpop.permute.xlu1 %1161  ;;  %v783_v11 = vsub.f32 %v1779_v45, %v766_v8  ;;  %v1171_v45 = vsub.f32 %v1823_v31, %v1157_v49 }
 0x551   :  { %851 = vperm.xlu1 %1381, %v481_v42  }
 0x552   :  { %v1167_v51 = vpop.permute.xlu0 %1166 }
 0x553   :  { %v1175_v3 = vsub.f32 %v1837_v17, %v1167_v51  ;;  %v1176_v6 = vsub.f32 %v1839_v1, %v1167_v51  ;;  %v787_v51 = vsub.f32 %v1799_v58, %v1922_v0 }
 0x554   :  { %v847_v56 = vpop.permute.xlu1 %846 }
 0x556   :  { %v842_v43 = vpop.permute.xlu0 %841 }
 0x5b1   :  { %v819_v61 = vpop.permute.xlu0 %818 }
 0x5b2   :  { %v833_v63 = vmul.f32 %v819_v61, %v785_v57  ;;  %v834_v5 = vmul.f32 %v819_v61, %v786_v59  ;;  %v1173_v59 = vsub.f32 %v1827_v14, %v1924_v53  ;;  %v1174_v61 = vsub.f32 %v1829_v15, %v1924_v53 }
 0x5b3   :  { %v814_v4 = vpop.permute.xlu1 %813 }
 0x5b4   :  { %v861_v9 = vadd.f32 %v847_v56, %v833_v63  ;;  %v862_v47 = vadd.f32 %v847_v56, %v834_v5  ;;  %v831_v10 = vmul.f32 %v814_v4, %v783_v11  ;;  %v832_v13 = vmul.f32 %v814_v4, %v784_v62 }
 0x5b6   :  { %v869_v23 = vmax.f32 %v861_v9, 0.0  ;;  %v870_v16 = vmax.f32 %v862_v47, 0.0  ;;  %v859_v18 = vadd.f32 %v842_v43, %v831_v10  ;;  %v860_v7 = vadd.f32 %v842_v43, %v832_v13 }
 0x5b7   :  { %v829_v19 = vpop.permute.xlu1 %828 }
 0x5b8   :  { %877 = vst [vmem:[#allocation7 + $0x10] sm:$0xff] %v869_v23  ;;  %878 = vst [vmem:[#allocation7 + $0x18] sm:$0xff] %v870_v16  ;;  %v867_v50 = vmax.f32 %v859_v18, 0.0  ;;  %v868_v52 = vmax.f32 %v860_v7, 0.0  ;;  %v837_v35 = vmul.f32 %v829_v19, %v789_v24  ;;  %v838_v31 = vmul.f32 %v829_v19, %v790_v28 }
 0x5ba   :  { %875 = vst [vmem:[#allocation7] sm:$0xff] %v867_v50  ;;  %876 = vst [vmem:[#allocation7 + $0x8] sm:$0xff] %v868_v52 }
 0x5bb   :  { %v1189_v20 = vpop.permute.xlu0 %1188  ;;  %v824_v21 = vpop.permute.xlu1 %823 }
 0x5bc   :  { %v1203_v26 = vmul.f32 %v1189_v20, %v1171_v45  ;;  %v1204_v27 = vmul.f32 %v1189_v20, %v1172_v48  ;;  %v835_v11 = vmul.f32 %v824_v21, %v787_v51 }
 0x5be   :  { %v1211_v33 = vadd.f32 %v1203_v26, %v847_v56  ;;  %v1212_v34 = vadd.f32 %v1204_v27, %v847_v56 }
 0x5bf   :  { %v1184_v36 = vpop.permute.xlu1 %1183 }
 0x5c0   :  { %v1219_v39 = vmax.f32 %v1211_v33, 0.0  ;;  %v1220_v37 = vmax.f32 %v1212_v34, 0.0  ;;  %v1201_v46 = vmul.f32 %v1184_v36, %v1169_v29  ;;  %v1202_v54 = vmul.f32 %v1184_v36, %v1170_v32  ;;  %v857_v40 = vpop.permute.xlu0 %856 }
 0x5c1   :  { %v865_v41 = vadd.f32 %v857_v40, %v837_v35  ;;  %v866_v30 = vadd.f32 %v857_v40, %v838_v31 }
 0x5c2   :  { %1228 = vst [vmem:[#allocation7 + $0x50] sm:$0xff] %v1219_v39  ;;  %1229 = vst [vmem:[#allocation7 + $0x58] sm:$0xff] %v1220_v37  ;;  %v1209_v12 = vadd.f32 %v1201_v46, %v842_v43  ;;  %v1210_v55 = vadd.f32 %v1202_v54, %v842_v43  ;;  %v788_v43 = vsub.f32 %v1801_v60, %v1922_v0 }
 0x5c3   :  { %v873_v38 = vmax.f32 %v865_v41, 0.0  ;;  %v874_v25 = vmax.f32 %v866_v30, 0.0  ;;  %v1199_v42 = vpop.permute.xlu1 %1198 }
 0x5c4   :  { %v1217_v8 = vmax.f32 %v1209_v12, 0.0  ;;  %v1218_v22 = vmax.f32 %v1210_v55, 0.0  ;;  %v1207_v44 = vmul.f32 %v1199_v42, %v1175_v3  ;;  %v1208_v2 = vmul.f32 %v1199_v42, %v1176_v6 }
 0x5c5   :  { %881 = vst [vmem:[#allocation7 + $0x30] sm:$0xff] %v873_v38  ;;  %882 = vst [vmem:[#allocation7 + $0x38] sm:$0xff] %v874_v25  ;;  %v836_v62 = vmul.f32 %v824_v21, %v788_v43 }
 0x5c6   :  { %1226 = vst [vmem:[#allocation7 + $0x40] sm:$0xff] %v1217_v8  ;;  %1227 = vst [vmem:[#allocation7 + $0x48] sm:$0xff] %v1218_v22  ;;  %v1215_v49 = vadd.f32 %v1207_v44, %v857_v40  ;;  %v1216_v56 = vadd.f32 %v1208_v2, %v857_v40 }
 0x5c7   :  { %v1194_v17 = vpop.permute.xlu1 %1193 }
 0x5c8   :  { %v1223_v57 = vmax.f32 %v1215_v49, 0.0  ;;  %v1224_v1 = vmax.f32 %v1216_v56, 0.0  ;;  %v1205_v63 = vmul.f32 %v1194_v17, %v1173_v59  ;;  %v1206_v5 = vmul.f32 %v1194_v17, %v1174_v61 }
 0x5ca   :  { %1232 = vst [vmem:[#allocation7 + $0x70] sm:$0xff] %v1223_v57  ;;  %1233 = vst [vmem:[#allocation7 + $0x78] sm:$0xff] %v1224_v1 }
 0x5cc   :  { %v852_v4 = vpop.permute.xlu1 %851 }
 0x5cd   :  { %v863_v9 = vadd.f32 %v852_v4, %v835_v11  ;;  %v864_v58 = vadd.f32 %v852_v4, %v836_v62  ;;  %v1213_v47 = vadd.f32 %v1205_v63, %v852_v4  ;;  %v1214_v10 = vadd.f32 %v1206_v5, %v852_v4 }
 0x5cf   :  { %v871_v60 = vmax.f32 %v863_v9, 0.0  ;;  %v872_v0 = vmax.f32 %v864_v58, 0.0  ;;  %v1221_v13 = vmax.f32 %v1213_v47, 0.0  ;;  %v1222_v14 = vmax.f32 %v1214_v10, 0.0 }
 0x5d1   :  { %879 = vst [vmem:[#allocation7 + $0x20] sm:$0xff] %v871_v60  ;;  %880 = vst [vmem:[#allocation7 + $0x28] sm:$0xff] %v872_v0 }
 0x5d2   :  { %1230 = vst [vmem:[#allocation7 + $0x60] sm:$0xff] %v1221_v13  ;;  %1231 = vst [vmem:[#allocation7 + $0x68] sm:$0xff] %v1222_v14 }
 0x5d3   :  { %1471 = shalt.err (!%p1468_p0)
}
 0x5d4   :  { %s1496_s18 = smov 256   ;;  %s1497_s19 = smov 16  }
 0x5d5   :  { %1245 = dma.vmem_to_hbm [thread:$0]  %s1240_s16, 2048, %s1958_s9, [#allocation4], %s1496_s18, %s1496_s18, %s1497_s19  }
 0x5d6   :  { %1484 = dma.done.wait [#allocation4], 2048  }
 0x5d7   :  { %1485 = vsyncadd [#allocation4], 4294965248 }
 0x5d8   :  { %1249 = vsyncpa [#allocation3], 1 }
 0x5d9   :  { %1250 = vsyncpa [#allocation6], 1 }
 0x5da   :  { %1251 = vsyncpa [#allocation4], 1 }

</bundles_post_ra>
